<compile_context>
chip_gen: v7x
topology: tpu7x:2x2x1
jax: 0.10.0
libtpu: 0.0.40
codegen_flags: <defaults>
</compile_context>

<pallas_src>
import jax
import jax.numpy as jnp
import numpy as np
from jax.experimental import pallas as pl
from jax.experimental.pallas import tpu as pltpu

# ----- config (mirrors the PyTorch `config` object) --------------------------
HIDDEN_DIM = 32                    # config.hidden_dim
TWO_H = 2 * HIDDEN_DIM             # 2H = 64
TRUNC_NORM_INIT_STD = 0.1          # config.trunc_norm_init_std (demo value)


# ----- kernel -----------------------------------------------------------------
def reduce_state_kernel(h_ref, c_ref, wh_t_ref, bh_ref, wc_t_ref, bc_ref,
                        out_h_ref, out_c_ref):
    # reduce_h: (TB, 2H) @ (2H, H) + bias, ReLU  — MXU matmul, f32 accumulate
    rh = jnp.dot(h_ref[...], wh_t_ref[...],
                 preferred_element_type=jnp.float32) + bh_ref[...]
    out_h_ref[...] = jnp.maximum(rh, 0.0).astype(out_h_ref.dtype)

    # reduce_c: same shape, different weights
    rc = jnp.dot(c_ref[...], wc_t_ref[...],
                 preferred_element_type=jnp.float32) + bc_ref[...]
    out_c_ref[...] = jnp.maximum(rc, 0.0).astype(out_c_ref.dtype)


# ----- wrapper ----------------------------------------------------------------
def reduce_state_forward(h, c, params, *, batch_block=None):
    """h, c: (num_directions=2, B, H) float32. Returns ((1,B,H), (1,B,H))."""
    L, B, H = h.shape
    assert L == 2 and H == HIDDEN_DIM
    two_h = L * H

    # torch: h.transpose(0, 1).contiguous().view(-1, 2H)
    h_in = jnp.transpose(h, (1, 0, 2)).reshape(B, two_h)
    c_in = jnp.transpose(c, (1, 0, 2)).reshape(B, two_h)

    wh_t = params["w_h"].T                 # (2H, H) — pre-transposed for MXU
    bh = params["b_h"].reshape(1, H)       # (1, H)
    wc_t = params["w_c"].T                 # (2H, H)
    bc = params["b_c"].reshape(1, H)       # (1, H)

    # Batch tiling: grid axis marked "parallel" (v7x second TC / megacore).
    # Block shapes obey the (8, 128) rule: second-last dim multiple of 8 or the
    # full extent; last dim always the full feature extent.
    if batch_block is None:
        batch_block = min(B, 256) if (B >= 8 and B % 8 == 0) else B
    if B % batch_block != 0:
        batch_block = B
    grid = (B // batch_block,)

    x_spec = pl.BlockSpec((batch_block, two_h), lambda i: (i, 0))
    w_spec = pl.BlockSpec((two_h, H), lambda i: (0, 0))
    b_spec = pl.BlockSpec((1, H), lambda i: (0, 0))
    o_spec = pl.BlockSpec((batch_block, H), lambda i: (i, 0))

    out_h, out_c = pl.pallas_call(
        reduce_state_kernel,
        out_shape=(
            jax.ShapeDtypeStruct((B, H), jnp.float32),
            jax.ShapeDtypeStruct((B, H), jnp.float32),
        ),
        grid=grid,
        in_specs=[x_spec, x_spec, w_spec, b_spec, w_spec, b_spec],
        out_specs=(o_spec, o_spec),
        compiler_params=pltpu.CompilerParams(
            dimension_semantics=("parallel",)),
    )(h_in, c_in, wh_t, bh, wc_t, bc)

    # torch: hidden_reduced_h.unsqueeze(0)
    return out_h[None], out_c[None]


# ----- pure-JAX reference (mirrors the PyTorch code line-by-line) -------------
def reduce_state_ref(h, c, params):
    L, B, H = h.shape
    h_in = jnp.transpose(h, (1, 0, 2)).reshape(B, L * H)
    c_in = jnp.transpose(c, (1, 0, 2)).reshape(B, L * H)
    reduced_h = jax.nn.relu(h_in @ params["w_h"].T + params["b_h"])
    reduced_c = jax.nn.relu(c_in @ params["w_c"].T + params["b_c"])
    return reduced_h[None], reduced_c[None]


# ----- main -------------------------------------------------------------------
if __name__ == "__main__":
    B = 16                        # small batch; grid=(2,) with batch_block=8
    key = jax.random.PRNGKey(0)
    ks = jax.random.split(key, 6)

    # deterministic parameter init (shapes from ReduceState.__init__ / init_linear_wt)
    params = {
        "w_h": jax.random.normal(ks[0], (HIDDEN_DIM, TWO_H), jnp.float32)
               * TRUNC_NORM_INIT_STD,                    # reduce_h.weight (H, 2H)
        "b_h": jax.random.normal(ks[1], (HIDDEN_DIM,), jnp.float32)
               * TRUNC_NORM_INIT_STD,                    # reduce_h.bias (H,)
        "w_c": jax.random.normal(ks[2], (HIDDEN_DIM, TWO_H), jnp.float32)
               * TRUNC_NORM_INIT_STD,                    # reduce_c.weight (H, 2H)
        "b_c": jax.random.normal(ks[3], (HIDDEN_DIM,), jnp.float32)
               * TRUNC_NORM_INIT_STD,                    # reduce_c.bias (H,)
    }

    # LSTM hidden state: (num_directions=2, B, H)
    h = jax.random.normal(ks[4], (2, B, HIDDEN_DIM), jnp.float32)
    c = jax.random.normal(ks[5], (2, B, HIDDEN_DIM), jnp.float32)

    out_h, out_c = reduce_state_forward(h, c, params)
    jax.block_until_ready((out_h, out_c))

    ref_h, ref_c = reduce_state_ref(h, c, params)

    assert out_h.shape == (1, B, HIDDEN_DIM) and out_c.shape == (1, B, HIDDEN_DIM)
    assert np.allclose(np.asarray(out_h), np.asarray(ref_h), rtol=1e-5, atol=1e-5)
    assert np.allclose(np.asarray(out_c), np.asarray(ref_c), rtol=1e-5, atol=1e-5)

    print("KERNEL_OK")
</pallas_src>

<mosaic_0001>
module attributes {stable_mosaic.version = 11 : i64} {
  func.func @reduce_state_kernel(%arg0: i32, %arg1: memref<16x64xf32, #tpu.memory_space<vmem>>, %arg2: memref<16x64xf32, #tpu.memory_space<vmem>>, %arg3: memref<64x32xf32, #tpu.memory_space<vmem>>, %arg4: memref<1x32xf32, #tpu.memory_space<vmem>>, %arg5: memref<64x32xf32, #tpu.memory_space<vmem>>, %arg6: memref<1x32xf32, #tpu.memory_space<vmem>>, %arg7: memref<16x32xf32, #tpu.memory_space<vmem>>, %arg8: memref<16x32xf32, #tpu.memory_space<vmem>>) attributes {dimension_semantics = [#tpu.dimension_semantics<parallel>], iteration_bounds = array<i64: 1>, scalar_prefetch = 0 : i64, scratch_operands = 0 : i64, tpu.core_type = #tpu.core_type<tc>, window_params = [{transform_indices = @transform_0, window_bounds = array<i64: 16, 64>}, {transform_indices = @transform_1, window_bounds = array<i64: 16, 64>}, {pipeline_mode = #tpu.pipeline_mode<synchronous>, transform_indices = @transform_2, window_bounds = array<i64: 64, 32>}, {pipeline_mode = #tpu.pipeline_mode<synchronous>, transform_indices = @transform_3, window_bounds = array<i64: 1, 32>}, {pipeline_mode = #tpu.pipeline_mode<synchronous>, transform_indices = @transform_4, window_bounds = array<i64: 64, 32>}, {pipeline_mode = #tpu.pipeline_mode<synchronous>, transform_indices = @transform_5, window_bounds = array<i64: 1, 32>}, {transform_indices = @transform_6, window_bounds = array<i64: 16, 32>}, {transform_indices = @transform_7, window_bounds = array<i64: 16, 32>}]} {
    %c0 = arith.constant 0 : index
    %c0_0 = arith.constant 0 : index
    %0 = vector.load %arg1[%c0, %c0_0] : memref<16x64xf32, #tpu.memory_space<vmem>>, vector<16x64xf32>
    %c0_1 = arith.constant 0 : index
    %c0_2 = arith.constant 0 : index
    %1 = vector.load %arg3[%c0_1, %c0_2] : memref<64x32xf32, #tpu.memory_space<vmem>>, vector<64x32xf32>
    %cst = arith.constant dense<0.000000e+00> : vector<16x32xf32>
    %2 = tpu.matmul %0, %1, %cst {dimension_numbers = #tpu.dot_dimension_numbers<[1], [0], [0], [1], [0, 0, 1, 1], [], []>} : vector<16x64xf32>, vector<64x32xf32>, vector<16x32xf32> -> vector<16x32xf32>
    %c0_3 = arith.constant 0 : index
    %c0_4 = arith.constant 0 : index
    %3 = vector.load %arg4[%c0_3, %c0_4] : memref<1x32xf32, #tpu.memory_space<vmem>>, vector<1x32xf32>
    %4 = vector.broadcast %3 : vector<1x32xf32> to vector<16x32xf32>
    %5 = arith.addf %2, %4 : vector<16x32xf32>
    %cst_5 = arith.constant 0.000000e+00 : f32
    %6 = vector.broadcast %cst_5 : f32 to vector<16x32xf32>
    %7 = arith.maximumf %5, %6 : vector<16x32xf32>
    %c0_6 = arith.constant 0 : index
    %c0_7 = arith.constant 0 : index
    %8 = vector.load %arg7[%c0_6, %c0_7] : memref<16x32xf32, #tpu.memory_space<vmem>>, vector<16x32xf32>
    tpu.vector_store %arg7[%c0_6, %c0_7], %7 {strides = array<i32>} : memref<16x32xf32, #tpu.memory_space<vmem>>, vector<16x32xf32>,
    %c0_8 = arith.constant 0 : index
    %c0_9 = arith.constant 0 : index
    %9 = vector.load %arg2[%c0_8, %c0_9] : memref<16x64xf32, #tpu.memory_space<vmem>>, vector<16x64xf32>
    %c0_10 = arith.constant 0 : index
    %c0_11 = arith.constant 0 : index
    %10 = vector.load %arg5[%c0_10, %c0_11] : memref<64x32xf32, #tpu.memory_space<vmem>>, vector<64x32xf32>
    %cst_12 = arith.constant dense<0.000000e+00> : vector<16x32xf32>
    %11 = tpu.matmul %9, %10, %cst_12 {dimension_numbers = #tpu.dot_dimension_numbers<[1], [0], [0], [1], [0, 0, 1, 1], [], []>} : vector<16x64xf32>, vector<64x32xf32>, vector<16x32xf32> -> vector<16x32xf32>
    %c0_13 = arith.constant 0 : index
    %c0_14 = arith.constant 0 : index
    %12 = vector.load %arg6[%c0_13, %c0_14] : memref<1x32xf32, #tpu.memory_space<vmem>>, vector<1x32xf32>
    %13 = vector.broadcast %12 : vector<1x32xf32> to vector<16x32xf32>
    %14 = arith.addf %11, %13 : vector<16x32xf32>
    %cst_15 = arith.constant 0.000000e+00 : f32
    %15 = vector.broadcast %cst_15 : f32 to vector<16x32xf32>
    %16 = arith.maximumf %14, %15 : vector<16x32xf32>
    %c0_16 = arith.constant 0 : index
    %c0_17 = arith.constant 0 : index
    %17 = vector.load %arg8[%c0_16, %c0_17] : memref<16x32xf32, #tpu.memory_space<vmem>>, vector<16x32xf32>
    tpu.vector_store %arg8[%c0_16, %c0_17], %16 {strides = array<i32>} : memref<16x32xf32, #tpu.memory_space<vmem>>, vector<16x32xf32>,
    return
  }
  func.func @transform_0(%arg0: i32) -> (i32, i32) {
    %c0_i32 = arith.constant 0 : i32
    %c0_i32_0 = arith.constant 0 : i32
    return %arg0, %c0_i32 : i32, i32
  }
  func.func @transform_1(%arg0: i32) -> (i32, i32) {
    %c0_i32 = arith.constant 0 : i32
    %c0_i32_0 = arith.constant 0 : i32
    return %arg0, %c0_i32 : i32, i32
  }
  func.func @transform_2(%arg0: i32) -> (i32, i32) {
    %c0_i32 = arith.constant 0 : i32
    %c0_i32_0 = arith.constant 0 : i32
    %c0_i32_1 = arith.constant 0 : i32
    return %c0_i32, %c0_i32_0 : i32, i32
  }
  func.func @transform_3(%arg0: i32) -> (i32, i32) {
    %c0_i32 = arith.constant 0 : i32
    %c0_i32_0 = arith.constant 0 : i32
    %c0_i32_1 = arith.constant 0 : i32
    return %c0_i32, %c0_i32_0 : i32, i32
  }
  func.func @transform_4(%arg0: i32) -> (i32, i32) {
    %c0_i32 = arith.constant 0 : i32
    %c0_i32_0 = arith.constant 0 : i32
    %c0_i32_1 = arith.constant 0 : i32
    return %c0_i32, %c0_i32_0 : i32, i32
  }
  func.func @transform_5(%arg0: i32) -> (i32, i32) {
    %c0_i32 = arith.constant 0 : i32
    %c0_i32_0 = arith.constant 0 : i32
    %c0_i32_1 = arith.constant 0 : i32
    return %c0_i32, %c0_i32_0 : i32, i32
  }
  func.func @transform_6(%arg0: i32) -> (i32, i32) {
    %c0_i32 = arith.constant 0 : i32
    %c0_i32_0 = arith.constant 0 : i32
    return %arg0, %c0_i32 : i32, i32
  }
  func.func @transform_7(%arg0: i32) -> (i32, i32) {
    %c0_i32 = arith.constant 0 : i32
    %c0_i32_0 = arith.constant 0 : i32
    return %arg0, %c0_i32 : i32, i32
  }
}

</mosaic_0001>

<bundles_post_ra>
// kernel: tpu_custom_call.1
= control target key start
LH: loop header
LB: loop body
LE: loop exit
PB: predicated region body
PF: predicated region fallthrough
CT: control target
= control target key end

     0   :  { %13 = vsyncpa [#allocation3], 0  ;;  %vm44_vm0 = vcmask 523264   ;;  %s562_s0 = inlined_call_operand.vmem [shape: f32[16,64], index: 0, kind: input, shape index: {}]   ;;  %s563_s1 = inlined_call_operand.vmem [shape: f32[16,64], index: 1, kind: input, shape index: {}]   ;;  %s564_s2 = inlined_call_operand.vmem [shape: f32[64,32], index: 2, kind: input, shape index: {}]   ;;  %s565_s3 = inlined_call_operand.vmem [shape: f32[1,32], index: 3, kind: input, shape index: {}]   ;;  %s566_s4 = inlined_call_operand.vmem [shape: f32[64,32], index: 4, kind: input, shape index: {}]   ;;  %s567_s5 = inlined_call_operand.vmem [shape: f32[1,32], index: 5, kind: input, shape index: {}]   ;;  %s568_s6 = inlined_call_operand.hbm [shape: f32[16,32], index: 6, kind: output, shape index: {0}]   ;;  %s569_s7 = inlined_call_operand.hbm [shape: f32[16,32], index: 7, kind: output, shape index: {1}]  }
   0x1   :  { %v29_v0 = vld [vmem:[%s564_s2] sm:$0xff]  ;;  %v30_v1 = vld [vmem:[%s564_s2 + $0x8] sm:$0xff]  ;;  %v31_v5 = vld [vmem:[%s564_s2 + $0x10] sm:$0xff] }
   0x2   :  { %v133_v2 = vld [vmem:[%s566_s4] sm:$0xff]  ;;  %v329_v3 = vpack.c.bf16 %v30_v1, %v29_v0  ;;  %v134_v4 = vld [vmem:[%s566_s4 + $0x8] sm:$0xff]  ;;  %v32_v6 = vld [vmem:[%s564_s2 + $0x18] sm:$0xff] }
   0x3   :  { %v345_v7 = vpack.c.bf16 %v134_v4, %v133_v2  ;;  %v333_v8 = vpack.c.bf16 %v32_v6, %v31_v5  ;;  %v135_v9 = vld [vmem:[%s566_s4 + $0x10] sm:$0xff]  ;;  %v136_v10 = vld [vmem:[%s566_s4 + $0x18] sm:$0xff]  ;;  %v33_v11 = vld [vmem:[%s564_s2 + $0x20] sm:$0xff] }
   0x4   :  { %330 = vmatprep.subr.bf16.mxu0 %v329_v3  ;;  %v349_v12 = vpack.c.bf16 %v136_v10, %v135_v9  ;;  %v34_v13 = vld [vmem:[%s564_s2 + $0x28] sm:$0xff]  ;;  %v137_v14 = vld [vmem:[%s566_s4 + $0x20] sm:$0xff]  ;;  %v35_v20 = vld [vmem:[%s564_s2 + $0x30] sm:$0xff] }
   0x5   :  { %v138_v15 = vld [vmem:[%s566_s4 + $0x28] sm:$0xff]  ;;  %346 = vmatprep.subr.bf16.mxu1 %v345_v7  ;;  %332 = vmatpush3.bf16.msra.mxu0 %v329_v3  ;;  %v337_v16 = vpack.c.bf16 %v34_v13, %v33_v11  ;;  %v27_v17 = vld [vmem:[%s562_s0] sm:$0xff]  ;;  %v36_v21 = vld [vmem:[%s564_s2 + $0x38] sm:$0xff] }
   0x6   :  { %348 = vmatpush3.bf16.msra.mxu1 %v345_v7  ;;  %334 = vmatprep.subr.bf16.mxu0 %v333_v8  ;;  %v131_v18 = vld [vmem:[%s563_s1] sm:$0xff]  ;;  %v353_v19 = vpack.c.bf16 %v138_v15, %v137_v14 }
   0x7   :  { %350 = vmatprep.subr.bf16.mxu1 %v349_v12  ;;  %307 = vmatprep.mubr.msk.f32.mxu0 %vm44_vm0, %v27_v17 }
   0x8   :  { %14 = vsyncpa [#allocation5], 0  ;;  %v139_v22 = vld [vmem:[%s566_s4 + $0x30] sm:$0xff]  ;;  %v140_v23 = vld [vmem:[%s566_s4 + $0x38] sm:$0xff]  ;;  %326 = vmatprep.mubr.msk.f32.mxu1 %vm44_vm0, %v131_v18  ;;  %v341_v24 = vpack.c.bf16 %v36_v21, %v35_v20  ;;  %s413_s20 = smov [#allocation2]   ;;  %vm128_vm1 = vcmask 261120  }
   0x9   :  { %336 = vmatpush3.bf16.msra.mxu0 %v333_v8  ;;  %v357_v25 = vpack.c.bf16 %v140_v23, %v139_v22  ;;  %v28_v26 = vld [vmem:[%s562_s0 + $0x8] sm:$0xff]  ;;  %v265_v28 = vld [vmem:[%s565_s3] ss:$0 sm:$0xff]  ;;  %s238_s0 = sshll.u32 %s413_s20, 4  ;;  %s239_s0 = int_to_ptr.vmem [resolvable:$true] %s238_s0 }
   0xa   :  { %352 = vmatpush3.bf16.msra.mxu1 %v349_v12  ;;  %338 = vmatprep.subr.bf16.mxu0 %v337_v16  ;;  %v132_v27 = vld [vmem:[%s563_s1 + $0x8] sm:$0xff]  ;;  %v268_v29 = vld [vmem:[%s567_s5] ss:$0 sm:$0xff]  ;;  %s414_s1 = smov [#allocation4]   ;;  %s365_s3 = scalar_lea.vmem %s239_s0, 256 }
   0xb   :  { %354 = vmatprep.subr.bf16.mxu1 %v353_v19  ;;  %s250_s21 = sshll.u32 %s414_s1, 4  ;;  %p366_p0 = scmp.ne.s32.totalorder %s239_s0, %s365_s3  ;;  %s528_s21 = int_to_ptr.vmem [resolvable:$true] %s250_s21 }
   0xc   :  { %p370_p1 = scmp.lt.s32.totalorder %s239_s0, %s239_s0  ;;  %p371_p2 = scmp.lt.s32.totalorder %s365_s3, %s365_s3 }
   0xd   :  { %340 = vmatpush3.bf16.msra.mxu0 %v337_v16 }
   0xe   :  { %356 = vmatpush3.bf16.msra.mxu1 %v353_v19  ;;  %342 = vmatprep.subr.bf16.mxu0 %v341_v24  ;;  %p372_p3 = por %p371_p2, %p370_p1 }
   0xf   :  { %358 = vmatprep.subr.bf16.mxu1 %v357_v25 }
  0x10   :  { %p373_p4 = pnand %p372_p3, %p366_p0 }
  0x11   :  { %344 = vmatpush3.bf16.msra.mxu0 %v341_v24 }
  0x12   :  { %360 = vmatpush3.bf16.msra.mxu1 %v357_v25 }
  0x14   :  { %308 = vmatmul.mubr.msk.f32.vlgmr.msra.gmra.mrb[0].mxu0 %vm44_vm0, %v28_v26 }
  0x15   :  { %327 = vmatmul.mubr.msk.f32.vlgmr.msra.gmra.mrb[0].mxu1 %vm44_vm0, %v132_v27 }
  0xe7   :  { %v309_v30 = vpop.f32.mrb[0].mxu0 }
  0xe8   :  { %v123_v31 = vadd.f32 %v309_v30, %v265_v28  ;;  %v328_v32 = vpop.f32.mrb[0].mxu1  ;;  %v117_v33 = vpop.f32.mrb[1].mxu0 }
  0xe9   :  { %v226_v34 = vadd.f32 %v328_v32, %v268_v29  ;;  %v118_v35 = vadd.f32 %v265_v28, %v117_v33  ;;  %v220_v36 = vpop.f32.mrb[1].mxu1 }
  0xea   :  { %v127_v37 = vmax.f32 %v123_v31, 0.0  ;;  %v221_v38 = vadd.f32 %v268_v29, %v220_v36 }
  0xeb   :  { %v230_v39 = vmax.f32 %v226_v34, 0.0  ;;  %v126_v40 = vmax.f32 %v118_v35, 0.0 }
  0xec   :  { %130 = vst.msk [vmem:[#allocation2 + $0x8] sm:$0xff] %vm128_vm1, %v127_v37  ;;  %v229_v41 = vmax.f32 %v221_v38, 0.0 }
  0xed   :  { %232 = vst.msk [vmem:[#allocation4 + $0x8] sm:$0xff] %vm128_vm1, %v230_v39  ;;  %129 = vst.msk [vmem:[#allocation2] sm:$0xff] %vm128_vm1, %v126_v40 }
  0xee   :  { %231 = vst.msk [vmem:[#allocation4] sm:$0xff] %vm128_vm1, %v229_v41 }
  0xef   :  { %376 = shalt.err (!%p373_p4)
}
  0xf0   :  { %s377_s23 = scalar_lea.hbm %s568_s6, 256 }
  0xf1   :  { %p378_p5 = scmp.ne.s32.totalorder %s568_s6, %s377_s23  ;;  %p381_p6 = scmp.lt.u32.totalorder %s377_s23, %s568_s6 }
  0xf3   :  { %p383_p7 = pnand %p381_p6, %p378_p5 }
  0xf5   :  { %386 = shalt.err (!%p383_p7)
}
  0xf6   :  { %s415_s28 = smov 128   ;;  %s416_s29 = smov 8  }
  0xf7   :  { %244 = dma.vmem_to_hbm [thread:$0]  %s239_s0, 256, %s568_s6, [#allocation3], %s415_s28, %s415_s28, %s416_s29  }
  0xf8   :  { %s387_s9 = scalar_lea.vmem %s528_s21, 256  ;;  %p392_p9 = scmp.lt.s32.totalorder %s528_s21, %s528_s21 }
  0xf9   :  { %p388_p8 = scmp.ne.s32.totalorder %s528_s21, %s387_s9  ;;  %p393_p10 = scmp.lt.s32.totalorder %s387_s9, %s387_s9 }
  0xfb   :  { %p394_p11 = por %p393_p10, %p392_p9 }
  0xfd   :  { %p395_p12 = pnand %p394_p11, %p388_p8 }
  0xff   :  { %398 = shalt.err (!%p395_p12)
}
 0x100   :  { %s399_s12 = scalar_lea.hbm %s569_s7, 256 }
 0x101   :  { %p400_p13 = scmp.ne.s32.totalorder %s569_s7, %s399_s12  ;;  %p403_p0 = scmp.lt.u32.totalorder %s399_s12, %s569_s7 }
 0x103   :  { %p405_p1 = pnand %p403_p0, %p400_p13 }
 0x105   :  { %408 = shalt.err (!%p405_p1)
}
 0x106   :  { %256 = dma.vmem_to_hbm [thread:$0]  %s528_s21, 256, %s569_s7, [#allocation5], %s415_s28, %s415_s28, %s416_s29  }
 0x107   :  { %409 = dma.done.wait [#allocation3], 256  }
 0x108   :  { %410 = vsyncadd [#allocation3], 4294967040 }
 0x109   :  { %411 = dma.done.wait [#allocation5], 256  }
 0x10a   :  { %412 = vsyncadd [#allocation5], 4294967040 }
 0x10b   :  { %263 = vsyncpa [#allocation3], 1 }
 0x10c   :  { %264 = vsyncpa [#allocation5], 1 }

</bundles_post_ra>
